<compile_context>
chip_gen: v7x
topology: tpu7x:2x2x1
jax: 0.10.0
libtpu: 0.0.40
codegen_flags: <defaults>
</compile_context>

<pallas_src>
import functools

import jax
import jax.numpy as jnp
from jax.experimental import pallas as pl
from jax.experimental.pallas import tpu as pltpu


def _round_up(x: int, m: int) -> int:
    return (x + m - 1) // m * m


def _cdiv(a: int, b: int) -> int:
    return (a + b - 1) // b


def _pad2(a, rows: int, cols: int):
    pr, pc = rows - a.shape[0], cols - a.shape[1]
    if pr == 0 and pc == 0:
        return a
    return jnp.pad(a, ((0, pr), (0, pc)))


def _f2_kernel(x_ref, w0_ref, b0_ref, w1_ref, b1_ref, w2_ref, b2_ref, o_ref):
    """x tile is bf16; weights are bf16 in (in, out) layout; biases f32.

    Every matmul is a plain [M,K]@[K,N] contraction (no RHS transpose), with f32
    MXU accumulation. Bias adds and ReLUs run in f32 on the VPU.
    """
    # Layer 0
    h = jnp.dot(x_ref[...], w0_ref[...], preferred_element_type=jnp.float32)
    h = jnp.maximum(h + b0_ref[...], 0.0)
    # Layer 1
    h = jnp.dot(h.astype(w1_ref.dtype), w1_ref[...], preferred_element_type=jnp.float32)
    h = jnp.maximum(h + b1_ref[...], 0.0)
    # Layer 2 (logits)
    out = jnp.dot(h.astype(w2_ref.dtype), w2_ref[...], preferred_element_type=jnp.float32)
    o_ref[...] = (out + b2_ref[...]).astype(o_ref.dtype)


def prepare_f2_params(W0, b0, W1, b1, W2, b2, use_bf16: bool = True):
    """One-time weight preprocessing: pad feature dims to x128, transpose to (in, out),
    cast weights to bf16. Call once and reuse across forward calls."""
    h0, d = W0.shape
    h1 = W1.shape[0]
    k = W2.shape[0]
    d_p, h0_p, h1_p, k_p = (_round_up(v, 128) for v in (d, h0, h1, k))
    wdt = jnp.bfloat16 if use_bf16 else jnp.float32

    W0t = _pad2(W0.T, d_p, h0_p).astype(wdt)    # (d_p, h0_p)
    W1t = _pad2(W1.T, h0_p, h1_p).astype(wdt)   # (h0_p, h1_p)
    W2t = _pad2(W2.T, h1_p, k_p).astype(wdt)    # (h1_p, k_p)
    b0p = _pad2(b0, 1, h0_p).astype(jnp.float32)
    b1p = _pad2(b1, 1, h1_p).astype(jnp.float32)
    b2p = _pad2(b2, 1, k_p).astype(jnp.float32)
    return (W0t, b0p, W1t, b1p, W2t, b2p), k


@functools.partial(jax.jit, static_argnames=("k", "tile_n"))
def f2_forward_prepared(x, W0t, b0p, W1t, b1p, W2t, b2p, *, k: int, tile_n: int = 512):
    """Hot path: x is (n, d) f32, prepared params are padded/(in,out)/bf16.

    Returns (n, k) f32 logits.
    """
    n, d = x.shape
    d_p, h0_p = W0t.shape
    h1_p, k_p = W2t.shape
    assert W1t.shape == (h0_p, h1_p)
    assert d <= d_p
    wdt = W0t.dtype

    # Row tile: multiple of 8, capped at tile_n, targeting >=4 grid steps when possible
    # so row tiles pipeline and (on v7x) shard across both TensorCores.
    tn = max(8, min(int(tile_n), _round_up(_cdiv(n, 4), 8)))
    n_p = _round_up(max(n, tn), tn)
    grid = (n_p // tn,)

    # Stream x as bf16 (pad + cast fused here; it is cast before the MXU anyway).
    x_p = _pad2(x, n_p, d_p).astype(wdt)

    # --- VMEM budget (bytes): resident weights (single-buffered) + biases
    #     + double-buffered x/out tiles + f32/bf16 intermediates, with 2x headroom.
    itemsize_w = jnp.dtype(wdt).itemsize
    bytes_w = (d_p * h0_p + h0_p * h1_p + h1_p * k_p) * itemsize_w
    bytes_b = (h0_p + h1_p + k_p) * 4
    bytes_x = 2 * tn * d_p * itemsize_w
    bytes_o = 2 * tn * k_p * 4
    bytes_act = tn * (h0_p + h1_p) * (4 + itemsize_w)
    needed = bytes_w + bytes_b + bytes_x + bytes_o + bytes_act
    try:
        phys_vmem = int(pltpu.get_tpu_info().vmem_capacity_bytes)
    except Exception:
        phys_vmem = 64 * 1024 * 1024  # conservative (v7x per-TC)
    vmem_limit = int(min(max(2 * needed, 32 * 1024 * 1024), phys_vmem - 8 * 1024 * 1024))

    flops = 2 * n_p * (d_p * h0_p + h0_p * h1_p + h1_p * k_p)
    bytes_accessed = (n_p * d_p * itemsize_w + bytes_w + bytes_b + n_p * k_p * 4)

    resident = dict(pipeline_mode=pl.Buffered(1))  # grid-invariant -> single buffer

    out = pl.pallas_call(
        _f2_kernel,
        out_shape=jax.ShapeDtypeStruct((n_p, k_p), jnp.float32),
        grid_spec=pltpu.PrefetchScalarGridSpec(
            num_scalar_prefetch=0,
            grid=grid,
            in_specs=[
                pl.BlockSpec((tn, d_p), lambda i: (i, 0)),                  # x: streamed
                pl.BlockSpec((d_p, h0_p), lambda i: (0, 0), **resident),    # W0^T
                pl.BlockSpec((1, h0_p), lambda i: (0, 0), **resident),      # b0
                pl.BlockSpec((h0_p, h1_p), lambda i: (0, 0), **resident),   # W1^T
                pl.BlockSpec((1, h1_p), lambda i: (0, 0), **resident),      # b1
                pl.BlockSpec((h1_p, k_p), lambda i: (0, 0), **resident),    # W2^T
                pl.BlockSpec((1, k_p), lambda i: (0, 0), **resident),       # b2
            ],
            out_specs=pl.BlockSpec((tn, k_p), lambda i: (i, 0)),
        ),
        compiler_params=pltpu.CompilerParams(
            dimension_semantics=("parallel",),
            vmem_limit_bytes=vmem_limit,
        ),
        cost_estimate=pl.CostEstimate(
            flops=flops, transcendentals=0, bytes_accessed=bytes_accessed),
    )(x_p, W0t, b0p, W1t, b1p, W2t, b2p)

    return out[:n, :k]


def f2_forward(x, W0, b0, W1, b1, W2, b2, *, tile_n: int = 512, use_bf16: bool = True):
    """Convenience wrapper matching F2.forward: prep params then run the kernel.
    For repeated inference, call prepare_f2_params once and use f2_forward_prepared."""
    (W0t, b0p, W1t, b1p, W2t, b2p), k = prepare_f2_params(
        W0, b0, W1, b1, W2, b2, use_bf16=use_bf16)
    return f2_forward_prepared(x, W0t, b0p, W1t, b1p, W2t, b2p, k=k, tile_n=tile_n)


def init_f2_params(key, h0, h1, d, k):
    """Deterministic Uniform(-alpha, alpha) init matching the PyTorch __init__."""
    a0 = 1.0 / jnp.sqrt(jnp.float32(d))
    a1 = 1.0 / jnp.sqrt(jnp.float32(h0))
    a2 = 1.0 / jnp.sqrt(jnp.float32(h1))
    ks = jax.random.split(key, 6)
    W0 = jax.random.uniform(ks[0], (h0, d), jnp.float32, -a0, a0)
    b0 = jax.random.uniform(ks[1], (1, h0), jnp.float32, -a0, a0)
    W1 = jax.random.uniform(ks[2], (h1, h0), jnp.float32, -a1, a1)
    b1 = jax.random.uniform(ks[3], (1, h1), jnp.float32, -a1, a1)
    W2 = jax.random.uniform(ks[4], (k, h1), jnp.float32, -a2, a2)
    b2 = jax.random.uniform(ks[5], (1, k), jnp.float32, -a2, a2)
    return W0, b0, W1, b1, W2, b2


def _ref_forward_f32(x, W0, b0, W1, b1, W2, b2):
    h = jnp.maximum(x @ W0.T + b0, 0.0)
    h = jnp.maximum(h @ W1.T + b1, 0.0)
    return h @ W2.T + b2


def _ref_forward_bf16(x, W0, b0, W1, b1, W2, b2):
    # Mimics the kernel's bf16-operand / f32-accumulation matmuls (x streamed as bf16).
    bf = jnp.bfloat16
    h = jnp.dot(x.astype(bf), W0.T.astype(bf), preferred_element_type=jnp.float32) + b0
    h = jnp.maximum(h, 0.0)
    h = jnp.dot(h.astype(bf), W1.T.astype(bf), preferred_element_type=jnp.float32) + b1
    h = jnp.maximum(h, 0.0)
    return jnp.dot(h.astype(bf), W2.T.astype(bf), preferred_element_type=jnp.float32) + b2


if __name__ == "__main__":
    # Small shapes consistent with the module's forward: x is (n, d).
    # n=64 -> tn=16 -> a 4-step pipelined row grid (exercises parallel semantics).
    n, d, h0, h1, k = 64, 32, 64, 32, 10

    key = jax.random.PRNGKey(0)
    kx, kp = jax.random.split(key)
    x = jax.random.normal(kx, (n, d), jnp.float32)
    W0, b0, W1, b1, W2, b2 = init_f2_params(kp, h0, h1, d, k)

    # One-time weight prep (hoisted out of the hot path), then the fused kernel.
    prepared, k_out = prepare_f2_params(W0, b0, W1, b1, W2, b2)
    out = f2_forward_prepared(x, *prepared, k=k_out, tile_n=512)
    out = jax.block_until_ready(out)
    assert out.shape == (n, k)

    # Tight check vs a reference that mirrors the kernel's bf16/f32 arithmetic.
    ref_bf16 = _ref_forward_bf16(x, W0, b0, W1, b1, W2, b2)
    assert jnp.allclose(out, ref_bf16, atol=5e-3, rtol=5e-3)

    # Looser sanity check vs the pure-f32 PyTorch-equivalent math.
    ref_f32 = _ref_forward_f32(x, W0, b0, W1, b1, W2, b2)
    assert jnp.allclose(out, ref_f32, atol=5e-2, rtol=5e-2)

    print("KERNEL_OK")
</pallas_src>

<mosaic_0001>
module attributes {stable_mosaic.version = 11 : i64} {
  func.func @_f2_kernel(%arg0: i32, %arg1: memref<16x128xbf16, #tpu.memory_space<vmem>>, %arg2: memref<128x128xbf16, #tpu.memory_space<vmem>>, %arg3: memref<1x128xf32, #tpu.memory_space<vmem>>, %arg4: memref<128x128xbf16, #tpu.memory_space<vmem>>, %arg5: memref<1x128xf32, #tpu.memory_space<vmem>>, %arg6: memref<128x128xbf16, #tpu.memory_space<vmem>>, %arg7: memref<1x128xf32, #tpu.memory_space<vmem>>, %arg8: memref<16x128xf32, #tpu.memory_space<vmem>>) attributes {dimension_semantics = [#tpu.dimension_semantics<parallel>], iteration_bounds = array<i64: 4>, scalar_prefetch = 0 : i64, scratch_operands = 0 : i64, tpu.core_type = #tpu.core_type<tc>, window_params = [{transform_indices = @transform_0, window_bounds = array<i64: 16, 128>}, {pipeline_mode = #tpu.pipeline_mode<synchronous>, transform_indices = @transform_1, window_bounds = array<i64: 128, 128>}, {pipeline_mode = #tpu.pipeline_mode<synchronous>, transform_indices = @transform_2, window_bounds = array<i64: 1, 128>}, {pipeline_mode = #tpu.pipeline_mode<synchronous>, transform_indices = @transform_3, window_bounds = array<i64: 128, 128>}, {pipeline_mode = #tpu.pipeline_mode<synchronous>, transform_indices = @transform_4, window_bounds = array<i64: 1, 128>}, {pipeline_mode = #tpu.pipeline_mode<synchronous>, transform_indices = @transform_5, window_bounds = array<i64: 128, 128>}, {pipeline_mode = #tpu.pipeline_mode<synchronous>, transform_indices = @transform_6, window_bounds = array<i64: 1, 128>}, {transform_indices = @transform_7, window_bounds = array<i64: 16, 128>}]} {
    %c0 = arith.constant 0 : index
    %c0_0 = arith.constant 0 : index
    %0 = vector.load %arg1[%c0, %c0_0] : memref<16x128xbf16, #tpu.memory_space<vmem>>, vector<16x128xbf16>
    %c0_1 = arith.constant 0 : index
    %c0_2 = arith.constant 0 : index
    %1 = vector.load %arg2[%c0_1, %c0_2] : memref<128x128xbf16, #tpu.memory_space<vmem>>, vector<128x128xbf16>
    %cst = arith.constant dense<0.000000e+00> : vector<16x128xf32>
    %2 = tpu.matmul %0, %1, %cst {dimension_numbers = #tpu.dot_dimension_numbers<[1], [0], [0], [1], [0, 0, 1, 1], [], []>} : vector<16x128xbf16>, vector<128x128xbf16>, vector<16x128xf32> -> vector<16x128xf32>
    %c0_3 = arith.constant 0 : index
    %c0_4 = arith.constant 0 : index
    %3 = vector.load %arg3[%c0_3, %c0_4] : memref<1x128xf32, #tpu.memory_space<vmem>>, vector<1x128xf32>
    %4 = vector.broadcast %3 : vector<1x128xf32> to vector<16x128xf32>
    %5 = arith.addf %2, %4 : vector<16x128xf32>
    %cst_5 = arith.constant 0.000000e+00 : f32
    %6 = vector.broadcast %cst_5 : f32 to vector<16x128xf32>
    %7 = arith.maximumf %5, %6 : vector<16x128xf32>
    %8 = arith.truncf %7 : vector<16x128xf32> to vector<16x128xbf16>
    %c0_6 = arith.constant 0 : index
    %c0_7 = arith.constant 0 : index
    %9 = vector.load %arg4[%c0_6, %c0_7] : memref<128x128xbf16, #tpu.memory_space<vmem>>, vector<128x128xbf16>
    %cst_8 = arith.constant dense<0.000000e+00> : vector<16x128xf32>
    %10 = tpu.matmul %8, %9, %cst_8 {dimension_numbers = #tpu.dot_dimension_numbers<[1], [0], [0], [1], [0, 0, 1, 1], [], []>} : vector<16x128xbf16>, vector<128x128xbf16>, vector<16x128xf32> -> vector<16x128xf32>
    %c0_9 = arith.constant 0 : index
    %c0_10 = arith.constant 0 : index
    %11 = vector.load %arg5[%c0_9, %c0_10] : memref<1x128xf32, #tpu.memory_space<vmem>>, vector<1x128xf32>
    %12 = vector.broadcast %11 : vector<1x128xf32> to vector<16x128xf32>
    %13 = arith.addf %10, %12 : vector<16x128xf32>
    %cst_11 = arith.constant 0.000000e+00 : f32
    %14 = vector.broadcast %cst_11 : f32 to vector<16x128xf32>
    %15 = arith.maximumf %13, %14 : vector<16x128xf32>
    %16 = arith.truncf %15 : vector<16x128xf32> to vector<16x128xbf16>
    %c0_12 = arith.constant 0 : index
    %c0_13 = arith.constant 0 : index
    %17 = vector.load %arg6[%c0_12, %c0_13] : memref<128x128xbf16, #tpu.memory_space<vmem>>, vector<128x128xbf16>
    %cst_14 = arith.constant dense<0.000000e+00> : vector<16x128xf32>
    %18 = tpu.matmul %16, %17, %cst_14 {dimension_numbers = #tpu.dot_dimension_numbers<[1], [0], [0], [1], [0, 0, 1, 1], [], []>} : vector<16x128xbf16>, vector<128x128xbf16>, vector<16x128xf32> -> vector<16x128xf32>
    %c0_15 = arith.constant 0 : index
    %c0_16 = arith.constant 0 : index
    %19 = vector.load %arg7[%c0_15, %c0_16] : memref<1x128xf32, #tpu.memory_space<vmem>>, vector<1x128xf32>
    %20 = vector.broadcast %19 : vector<1x128xf32> to vector<16x128xf32>
    %21 = arith.addf %18, %20 : vector<16x128xf32>
    %c0_17 = arith.constant 0 : index
    %c0_18 = arith.constant 0 : index
    %22 = vector.load %arg8[%c0_17, %c0_18] : memref<16x128xf32, #tpu.memory_space<vmem>>, vector<16x128xf32>
    tpu.vector_store %arg8[%c0_17, %c0_18], %21 {strides = array<i32>} : memref<16x128xf32, #tpu.memory_space<vmem>>, vector<16x128xf32>,
    return
  }
  func.func @transform_0(%arg0: i32) -> (i32, i32) {
    %c0_i32 = arith.constant 0 : i32
    %c0_i32_0 = arith.constant 0 : i32
    return %arg0, %c0_i32 : i32, i32
  }
  func.func @transform_1(%arg0: i32) -> (i32, i32) {
    %c0_i32 = arith.constant 0 : i32
    %c0_i32_0 = arith.constant 0 : i32
    %c0_i32_1 = arith.constant 0 : i32
    return %c0_i32, %c0_i32_0 : i32, i32
  }
  func.func @transform_2(%arg0: i32) -> (i32, i32) {
    %c0_i32 = arith.constant 0 : i32
    %c0_i32_0 = arith.constant 0 : i32
    %c0_i32_1 = arith.constant 0 : i32
    return %c0_i32, %c0_i32_0 : i32, i32
  }
  func.func @transform_3(%arg0: i32) -> (i32, i32) {
    %c0_i32 = arith.constant 0 : i32
    %c0_i32_0 = arith.constant 0 : i32
    %c0_i32_1 = arith.constant 0 : i32
    return %c0_i32, %c0_i32_0 : i32, i32
  }
  func.func @transform_4(%arg0: i32) -> (i32, i32) {
    %c0_i32 = arith.constant 0 : i32
    %c0_i32_0 = arith.constant 0 : i32
    %c0_i32_1 = arith.constant 0 : i32
    return %c0_i32, %c0_i32_0 : i32, i32
  }
  func.func @transform_5(%arg0: i32) -> (i32, i32) {
    %c0_i32 = arith.constant 0 : i32
    %c0_i32_0 = arith.constant 0 : i32
    %c0_i32_1 = arith.constant 0 : i32
    return %c0_i32, %c0_i32_0 : i32, i32
  }
  func.func @transform_6(%arg0: i32) -> (i32, i32) {
    %c0_i32 = arith.constant 0 : i32
    %c0_i32_0 = arith.constant 0 : i32
    %c0_i32_1 = arith.constant 0 : i32
    return %c0_i32, %c0_i32_0 : i32, i32
  }
  func.func @transform_7(%arg0: i32) -> (i32, i32) {
    %c0_i32 = arith.constant 0 : i32
    %c0_i32_0 = arith.constant 0 : i32
    return %arg0, %c0_i32 : i32, i32
  }
}

</mosaic_0001>

<bundles_post_ra>
// kernel: f2_forward_prepared.1
= control target key start
LH: loop header
LB: loop body
LE: loop exit
PB: predicated region body
PF: predicated region fallthrough
CT: control target
= control target key end

     0   :  { %12 = vsyncpa [#allocation3], 0  ;;  %s979_s24 = smov 0   ;;  %s1132_s0 = inlined_call_operand.vmem [shape: bf16[64,128], index: 0, kind: input, shape index: {}]   ;;  %s1133_s1 = inlined_call_operand.vmem [shape: bf16[128,128], index: 1, kind: input, shape index: {}]   ;;  %s1134_s2 = inlined_call_operand.vmem [shape: f32[1,128], index: 2, kind: input, shape index: {}]   ;;  %s1135_s3 = inlined_call_operand.vmem [shape: bf16[128,128], index: 3, kind: input, shape index: {}]   ;;  %s1136_s4 = inlined_call_operand.vmem [shape: f32[1,128], index: 4, kind: input, shape index: {}]   ;;  %s1137_s5 = inlined_call_operand.hbm [shape: bf16[128,128], index: 5, kind: input, shape index: {}]   ;;  %s1138_s6 = inlined_call_operand.vmem [shape: f32[1,128], index: 6, kind: input, shape index: {}]   ;;  %s1139_s7 = inlined_call_operand.vmem [shape: f32[64,128], index: 7, kind: output, shape index: {}]  }
   0x1 LB: > { %s718_s25 = sadd.s32 4294967295, %s932_s24   ;;  %p720_p0 = scmp.ge.s32.totalorder %s932_s24, 1  ;;  %s932_s24 = sphi %s979_s24, %s18_s24  }
   0x2   : > { %p201_p1 = scmp.lt.s32.totalorder %s932_s24, 5  ;;  %s934_s26 = smov [#allocation2]  }
   0x3   : > { %s225_s27 = sshll.u32 %s934_s26, 4  ;;  %p993_p3 = scmp.eq.s32.totalorder %s718_s25, 0  ;;  %s226_s27 = int_to_ptr.vmem [resolvable:$true] %s225_s27 }
   0x4   : > { %p987_p2 = pnand %p720_p0, %p201_p1  ;;  %s894_s10 = scalar_lea.hbm %s1137_s5, 1024 }
   0x5   : > { %s1144_s29 = scalar_select %p993_p3, 1, 0 }
   0x6   : > { %s1143_s28 = scalar_select %p987_p2, 1, 0 }
   0x7   : > { %p850_p4 = pneg %p987_p2  ;;  %p895_p6 = scmp.ne.s32.totalorder %s1137_s5, %s894_s10 }
   0x8   : > { %p901_p10 = scmp.lt.u32.totalorder %s894_s10, %s1137_s5 }
   0x9   : > { %p1001_p5 = pnand %p993_p3, %p850_p4 }
   0xb   : > { %p896_p7 = pneg %p1001_p5 }
   0xd   : > { %p897_p8 = pnand %p896_p7, %p895_p6 }
   0xf   : > { %p898_p9 = pneg %p897_p8 }
  0x11   : > { %p903_p11 = pnand %p901_p10, %p898_p9 }
  0x13   : > { %906 = shalt.err (!%p903_p11)
}
  0x14   : > { %s907_s15 = scalar_lea.vmem %s226_s27, 1024  ;;  %p915_p1 = scmp.lt.s32.totalorder %s226_s27, %s226_s27 }
  0x15   : > { %p908_p12 = scmp.ne.s32.totalorder %s226_s27, %s907_s15  ;;  %p916_p4 = scmp.lt.s32.totalorder %s907_s15, %s907_s15 }
  0x17   : > { %p910_p13 = pnand %p908_p12, %p896_p7  ;;  %p917_p3 = por %p916_p4, %p915_p1 }
  0x19   : > { %p911_p0 = pneg %p910_p13 }
  0x1b   : > { %p918_p2 = pnand %p917_p3, %p911_p0 }
  0x1d   : > { %921 = shalt.err (!%p918_p2)
}
  0x1e   : > { %s935_s16 = smov 64   ;;  %s936_s17 = smov 4  }
  0x1f   : > { %853 = dma.hbm_to_vmem [thread:$0]  (!%p1001_p5), %s1137_s5, 1024, %s226_s27, [#allocation3], %s935_s16, %s935_s16, %s936_s17  }
  0x20   : > { %p1146_p6 = scmp.ne.s32.totalorder %s1143_s28, 0 }
  0x21   : > { %p1147_p8 = scmp.ne.s32.totalorder (!%p1146_p6), %s1144_s29, 0 }
  0x22   : > { %253 = sbr.rel (%p1146_p6) target bundleno = 733 (0x2dd), region = 48 }
  0x29   : > { %927 = dma.done.wait (%p1147_p8), [#allocation3], 1024  }
  0x2a   : > { %929 = vsyncadd (%p1147_p8), [#allocation3], 4294966272  ;;  %s725_s20 = sshll.u32 %s718_s25, 1  ;;  %v937_v0 = vmov 0.0   ;;  %vm938_vm0 = vmmov 0   ;;  %v869_v1 = vld [vmem:[%s1133_s1] sm:$0xff]  }
  0x2b   : > { %786 = vmatprep.subr.bf16.mxu0 %v937_v0  ;;  %802 = vmatprep.mubr.msk.bf16.mxu0 %vm938_vm0, %v937_v0  ;;  %p286_p2 = scmp.lt.s32.totalorder %s725_s20, 7  ;;  %v870_v2 = vld [vmem:[%s1133_s1 + $0x8] sm:$0xff]   ;;  %v871_v3 = vld [vmem:[%s1133_s1 + $0x10] sm:$0xff]   ;;  %v878_v4 = vld [vmem:[%s1135_s3] sm:$0xff]  }
  0x2c   : > { %806 = vmatprep.subr.bf16.mxu1 %v937_v0  ;;  %822 = vmatprep.mubr.msk.bf16.mxu1 %vm938_vm0, %v937_v0  ;;  %v872_v5 = vld [vmem:[%s1133_s1 + $0x18] sm:$0xff]   ;;  %v879_v6 = vld [vmem:[%s1135_s3 + $0x8] sm:$0xff]   ;;  %v873_v7 = vld [vmem:[%s1133_s1 + $0x20] sm:$0xff]  }
  0x2d   : > { %s1149_s20 = smov (!%p286_p2, %s725_s20), 7  ;;  %787 = vmatpush3.bf16.msra.mxu0 %v869_v1  ;;  %807 = vmatpush3.bf16.msra.mxu1 %v878_v4  ;;  %v880_v8 = vld [vmem:[%s1135_s3 + $0x10] sm:$0xff]   ;;  %v874_v9 = vld [vmem:[%s1133_s1 + $0x28] sm:$0xff]   ;;  %v881_v10 = vld [vmem:[%s1135_s3 + $0x18] sm:$0xff]  }
  0x2e   : > { %788 = vmatprep.subr.bf16.mxu0 %v937_v0  ;;  %s726_s26 = sshll.u32 %s1149_s20, 2  ;;  %808 = vmatprep.subr.bf16.mxu1 %v937_v0  ;;  %v875_v11 = vld [vmem:[%s1133_s1 + $0x30] sm:$0xff]   ;;  %v882_v12 = vld [vmem:[%s1135_s3 + $0x20] sm:$0xff]   ;;  %v876_v13 = vld [vmem:[%s1133_s1 + $0x38] sm:$0xff]   ;;  %s728_s18 = sshll.u32 %s1149_s20, 3 }
  0x2f   : > { %s1052_s8 = scalar_lea.vmem %s1132_s0, %s726_s26  ;;  %v883_v14 = vld [vmem:[%s1135_s3 + $0x28] sm:$0xff]   ;;  %v884_v16 = vld [vmem:[%s1135_s3 + $0x30] sm:$0xff]   ;;  %v885_v17 = vld [vmem:[%s1135_s3 + $0x38] sm:$0xff]   ;;  %s295_s25 = scalar_lea.vmem %s1139_s7, %s728_s18 }
  0x30   : > { %v877_v15 = vld [vmem:[%s1052_s8] sm:$0xff]   ;;  %v887_v19 = vld [vmem:[#allocation2 + $0x8] sm:$0xff]   ;;  %v888_v20 = vld [vmem:[#allocation2 + $0x10] sm:$0xff]  }
  0x31   : > { %789 = vmatpush3.bf16.msra.mxu0 %v870_v2  ;;  %809 = vmatpush3.bf16.msra.mxu1 %v879_v6  ;;  %v886_v18 = vld [vmem:[#allocation2] sm:$0xff]   ;;  %v889_v21 = vld [vmem:[#allocation2 + $0x18] sm:$0xff]   ;;  %v891_v23 = vld [vmem:[#allocation2 + $0x28] sm:$0xff]  }
  0x32   : > { %790 = vmatprep.subr.bf16.mxu0 %v937_v0  ;;  %810 = vmatprep.subr.bf16.mxu1 %v937_v0  ;;  %v890_v22 = vld [vmem:[#allocation2 + $0x20] sm:$0xff]   ;;  %v892_v34 = vld [vmem:[#allocation2 + $0x30] sm:$0xff]   ;;  %v893_v35 = vld [vmem:[#allocation2 + $0x38] sm:$0xff]  }
  0x33   : > { %v729_v24 = vld [vmem:[%s1134_s2] ss:$0 sm:$0xff] }
  0x34   : > { %v739_v36 = vld [vmem:[%s1136_s4] ss:$0 sm:$0xff] }
  0x35   : > { %791 = vmatpush3.bf16.msra.mxu0 %v871_v3  ;;  %811 = vmatpush3.bf16.msra.mxu1 %v880_v8  ;;  %v748_v46 = vld [vmem:[%s1138_s6] ss:$0 sm:$0xff] }
  0x36   : > { %792 = vmatprep.subr.bf16.mxu0 %v937_v0  ;;  %812 = vmatprep.subr.bf16.mxu1 %v937_v0 }
  0x39   : > { %793 = vmatpush3.bf16.msra.mxu0 %v872_v5  ;;  %813 = vmatpush3.bf16.msra.mxu1 %v881_v10 }
  0x3a   : > { %794 = vmatprep.subr.bf16.mxu0 %v937_v0  ;;  %814 = vmatprep.subr.bf16.mxu1 %v937_v0 }
  0x3d   : > { %795 = vmatpush3.bf16.msra.mxu0 %v873_v7  ;;  %815 = vmatpush3.bf16.msra.mxu1 %v882_v12 }
  0x3e   : > { %796 = vmatprep.subr.bf16.mxu0 %v937_v0  ;;  %816 = vmatprep.subr.bf16.mxu1 %v937_v0 }
  0x41   : > { %797 = vmatpush3.bf16.msra.mxu0 %v874_v9  ;;  %817 = vmatpush3.bf16.msra.mxu1 %v883_v14 }
  0x42   : > { %798 = vmatprep.subr.bf16.mxu0 %v937_v0  ;;  %818 = vmatprep.subr.bf16.mxu1 %v937_v0 }
  0x45   : > { %799 = vmatpush3.bf16.msra.mxu0 %v875_v11  ;;  %819 = vmatpush3.bf16.msra.mxu1 %v884_v16 }
  0x46   : > { %800 = vmatprep.subr.bf16.mxu0 %v937_v0  ;;  %820 = vmatprep.subr.bf16.mxu1 %v937_v0 }
  0x49   : > { %801 = vmatpush3.bf16.msra.mxu0 %v876_v13  ;;  %821 = vmatpush3.bf16.msra.mxu1 %v885_v17 }
  0x4a   : > { %826 = vmatprep.subr.bf16.mxu0 %v937_v0 }
  0x4c   : > { %803 = vmatmul.mubr.bf16.vlgmr.msra.gmra.mrb[0].mxu0 %v877_v15 }
  0x4d   : > { %842 = vmatprep.mubr.msk.bf16.mxu0 %vm938_vm0, %v937_v0  ;;  %827 = vmatpush3.bf16.msra.mxu0 %v886_v18 }
  0x4e   : > { %828 = vmatprep.subr.bf16.mxu0 %v937_v0 }
  0x51   : > { %829 = vmatpush3.bf16.msra.mxu0 %v887_v19 }
  0x52   : > { %830 = vmatprep.subr.bf16.mxu0 %v937_v0 }
  0x55   : > { %831 = vmatpush3.bf16.msra.mxu0 %v888_v20 }
  0x56   : > { %832 = vmatprep.subr.bf16.mxu0 %v937_v0 }
  0x59   : > { %833 = vmatpush3.bf16.msra.mxu0 %v889_v21 }
  0x5a   : > { %834 = vmatprep.subr.bf16.mxu0 %v937_v0 }
  0x5d   : > { %835 = vmatpush3.bf16.msra.mxu0 %v890_v22 }
  0x5e   : > { %836 = vmatprep.subr.bf16.mxu0 %v937_v0 }
  0x61   : > { %837 = vmatpush3.bf16.msra.mxu0 %v891_v23 }
  0x62   : > { %838 = vmatprep.subr.bf16.mxu0 %v937_v0 }
  0x65   : > { %839 = vmatpush3.bf16.msra.mxu0 %v892_v34 }
  0x66   : > { %840 = vmatprep.subr.bf16.mxu0 %v937_v0 }
  0x69   : > { %841 = vmatpush3.bf16.msra.mxu0 %v893_v35 }
 0x11f   : > { %v411_v25 = vpop.f32.mrb[0].mxu0 }
 0x120   : > { %v412_v26 = vadd.f32 %v729_v24, %v411_v25  ;;  %v804_v27 = vpop.f32.mrb[1].mxu0 }
 0x121   : > { %v414_v28 = vpop.f32.mrb[2].mxu0 }
 0x122   : > { %v415_v29 = vadd.f32 %v729_v24, %v414_v28  ;;  %v805_v30 = vpop.f32.mrb[3].mxu0  ;;  %v418_v31 = vmax.f32 %v412_v26, 0.0 }
 0x124   : > { %v419_v32 = vmax.f32 %v415_v29, 0.0 }
 0x126   : > { %v420_v33 = vpack.c.bf16 %v419_v32, %v418_v31 }
 0x128   : > { %823 = vmatmul.mubr.bf16.vlgmr.msra.gmra.mrb[0].mxu1 %v420_v33 }
 0x1fb   : > { %v526_v37 = vpop.f32.mrb[0].mxu1 }
 0x1fc   : > { %v527_v38 = vadd.f32 %v739_v36, %v526_v37  ;;  %v824_v39 = vpop.f32.mrb[1].mxu1 }
 0x1fd   : > { %v529_v40 = vpop.f32.mrb[2].mxu1 }
 0x1fe   : > { %v530_v41 = vadd.f32 %v739_v36, %v529_v40  ;;  %v825_v42 = vpop.f32.mrb[3].mxu1  ;;  %v533_v43 = vmax.f32 %v527_v38, 0.0 }
 0x200   : > { %v534_v44 = vmax.f32 %v530_v41, 0.0 }
 0x202   : > { %v535_v45 = vpack.c.bf16 %v534_v44, %v533_v43 }
 0x204   : > { %843 = vmatmul.mubr.bf16.vlgmr.msra.gmra.mrb[4].mxu0 %v535_v45 }
 0x2d7   : > { %v641_v47 = vpop.f32.mrb[4].mxu0 }
 0x2d8   : > { %v642_v48 = vadd.f32 %v748_v46, %v641_v47  ;;  %v844_v49 = vpop.f32.mrb[5].mxu0 }
 0x2d9   : > { %v644_v50 = vpop.f32.mrb[6].mxu0 }
 0x2da   : > { %648 = vst [vmem:[%s295_s25] sm:$0xff] %v642_v48  ;;  %v645_v51 = vadd.f32 %v748_v46, %v644_v50  ;;  %v845_v52 = vpop.f32.mrb[7].mxu0 }
 0x2dc   : > { %649 = vst [vmem:[%s295_s25 + $0x8] sm:$0xff] %v645_v51 }
 0x2dd PF: > { %s18_s24 = sadd.s32 1, %s932_s24  }
 0x2de   : > { %p15_p3 = scmp.ge.s32.totalorder %s18_s24, 6  }
 0x2e0   :  { %17 = sbr.rel (!%p15_p3) target bundleno = 1 (0x1), region = 83 }
 0x2e7   :  { %672 = vsyncpa [#allocation3], 1 }
 0x2e8   :  { %674 = vsyncpa [#allocation3 + $0x1], 1 }

</bundles_post_ra>
